<compile_context>
chip_gen: v7x
topology: tpu7x:2x2x1
jax: 0.10.0
libtpu: 0.0.40
codegen_flags: <defaults>
</compile_context>

<pallas_src>
import functools

import jax
import jax.numpy as jnp
from jax import lax
from jax.experimental import pallas as pl
from jax.experimental.pallas import tpu as pltpu

_VMEM_LIMIT = 32 * 1024 * 1024  # > v5e's 16 MiB default, < v7x's 64 MiB physical


def _round_up(x, m):
    return ((x + m - 1) // m) * m


def _pick_tile(npad):
    for t in (512, 256, 128):
        if npad % t == 0:
            return t
    return npad


# ----------------------------------------------------------------------------
# Kernel 1: tiled pairwise squared distances (queries x sources)
# ----------------------------------------------------------------------------

def _pairwise_d2_kernel(q_ref, sT_ref, o_ref):
    """o[i, j] = || q[i] - s[j] ||^2 via 3 unrolled VPU broadcast passes."""
    q = q_ref[0]        # (tq, 3)  queries channels-last  (rows -> sublanes)
    sT = sT_ref[0]      # (3, tm)  sources channels-first (cols -> lanes)
    diff = q[:, 0:1] - sT[0:1, :]
    acc = diff * diff
    for c in (1, 2):
        diff = q[:, c:c + 1] - sT[c:c + 1, :]
        acc = acc + diff * diff
    o_ref[0] = acc


def pairwise_d2(detect_point, point_cloud):
    """d2[b, i, j] = || detect_point[b,i] - point_cloud[b,j] ||^2 (tiled)."""
    B, N, _ = detect_point.shape
    M = point_cloud.shape[1]

    # query (row) tile — sublane axis, multiple of 8
    Np = _round_up(N, 8)
    if Np > 256:
        Np = _round_up(N, 256)
        tq = 256
    else:
        tq = Np
    # source (column) tile — lane axis, multiple of 128
    Mp = _round_up(M, 128)
    if Mp > 512:
        Mp = _round_up(M, 512)
        tm = 512
    else:
        tm = Mp

    q = jnp.zeros((B, Np, 3), jnp.float32).at[:, :N].set(detect_point)
    # padded sources get a huge sentinel so they never enter the min / kNN
    sT = jnp.full((B, 3, Mp), 1e6, jnp.float32).at[:, :, :M].set(
        jnp.transpose(point_cloud, (0, 2, 1)))

    d2 = pl.pallas_call(
        _pairwise_d2_kernel,
        out_shape=jax.ShapeDtypeStruct((B, Np, Mp), jnp.float32),
        grid=(B, Np // tq, Mp // tm),
        in_specs=[
            pl.BlockSpec((1, tq, 3), lambda b, i, j: (b, i, 0)),
            pl.BlockSpec((1, 3, tm), lambda b, i, j: (b, 0, j)),
        ],
        out_specs=pl.BlockSpec((1, tq, tm), lambda b, i, j: (b, i, j)),
        compiler_params=pltpu.CompilerParams(
            dimension_semantics=("parallel", "parallel", "parallel"),
            vmem_limit_bytes=_VMEM_LIMIT),
    )(q, sT)
    return d2[:, :N, :M]


# ----------------------------------------------------------------------------
# Kernel 2: fused decoder MLP (upsample linear+ReLU -> split -> cls MLP -> tanh)
# Transposed layout: point rows on lanes -> lane-dense stores; bf16 MXU operands.
# ----------------------------------------------------------------------------

def _decoder_mlp_kernel(dd, ds, xT_ref, upw_ref, upb_ref, w1_ref, b1_ref,
                        w2_ref, b2_ref, o_ref):
    x = xT_ref[0]                                                   # (Cin, tr) bf16
    up = jnp.dot(upw_ref[...], x, preferred_element_type=jnp.float32)
    up = jnp.maximum(up + upb_ref[...], 0.0)                        # (dd*ds, tr) f32
    for s in range(ds):                                             # static: ds in {1, 2}
        h = up[s * dd:(s + 1) * dd, :].astype(jnp.bfloat16)         # (dd, tr)
        z = jnp.dot(w1_ref[...], h, preferred_element_type=jnp.float32)
        z = jnp.maximum(z + b1_ref[...], 0.0).astype(jnp.bfloat16)  # (dd//2, tr)
        o = jnp.tanh(jnp.dot(w2_ref[...], z, preferred_element_type=jnp.float32)
                     + b2_ref[...])                                 # (2, tr)
        o_ref[0, 2 * s:2 * (s + 1), :] = o


def decoder_forward(p, feature_src, knn_idx, knn_d2, dim_scale, decoder_dim):
    """kNN inverse-d2 interpolation of feature_src onto the selected detect
    points, then the fused (upsample + cls) MLP Pallas kernel."""
    B, Nd, _ = knn_idx.shape
    Cin = feature_src.shape[-1]

    # inverse-squared-distance interpolation weights (PointNet++ convention)
    w = 1.0 / (knn_d2 + 1e-8)
    w = w / jnp.sum(w, axis=-1, keepdims=True)
    gathered = jax.vmap(lambda f, i: f[i])(feature_src, knn_idx)   # (B, Nd, k, Cin)
    interp = jnp.einsum("bnk,bnkc->bnc", w, gathered)              # (B, Nd, Cin)

    Ndp = _round_up(Nd, 128)
    tr = _pick_tile(Ndp)
    xT = jnp.zeros((B, Cin, Ndp), jnp.bfloat16).at[:, :, :Nd].set(
        jnp.transpose(interp, (0, 2, 1)).astype(jnp.bfloat16))

    dd, ds = decoder_dim, dim_scale
    upwT = p["up_w"].T.astype(jnp.bfloat16)               # (dd*ds, Cin)
    upb = p["up_b"].reshape(-1, 1)                        # (dd*ds, 1) f32
    w1T = p["cls_w1"].T.astype(jnp.bfloat16)              # (dd//2, dd)
    b1 = p["cls_b1"].reshape(-1, 1)                       # (dd//2, 1)
    # only the first 2 of the 3 tanh outputs are ever consumed by the scatter
    w2T = p["cls_w2"][:, :2].T.astype(jnp.bfloat16)       # (2, dd//2)
    b2 = p["cls_b2"][:, :2].reshape(-1, 1)                # (2, 1)

    out = pl.pallas_call(
        functools.partial(_decoder_mlp_kernel, dd, ds),
        out_shape=jax.ShapeDtypeStruct((B, 2 * ds, Ndp), jnp.float32),
        grid=(B, Ndp // tr),
        in_specs=[
            pl.BlockSpec((1, Cin, tr), lambda b, i: (b, 0, i)),
            # weights/biases: constant index_map -> DMA'd once, resident in VMEM
            pl.BlockSpec((dd * ds, Cin), lambda b, i: (0, 0)),
            pl.BlockSpec((dd * ds, 1), lambda b, i: (0, 0)),
            pl.BlockSpec((dd // 2, dd), lambda b, i: (0, 0)),
            pl.BlockSpec((dd // 2, 1), lambda b, i: (0, 0)),
            pl.BlockSpec((2, dd // 2), lambda b, i: (0, 0)),
            pl.BlockSpec((2, 1), lambda b, i: (0, 0)),
        ],
        out_specs=pl.BlockSpec((1, 2 * ds, tr), lambda b, i: (b, 0, i)),
        compiler_params=pltpu.CompilerParams(
            dimension_semantics=("parallel", "parallel"),
            vmem_limit_bytes=_VMEM_LIMIT),
    )(xT, upwT, upb, w1T, b1, w2T, b2)

    out = out[:, :, :Nd]                                   # (B, 2*ds, Nd)
    # channel index = s*2 + c ; row n*ds + s of the torch-equivalent reshape
    out = out.reshape(B, ds, 2, Nd).transpose(0, 3, 1, 2).reshape(B, Nd * ds, 2)
    return out


# ----------------------------------------------------------------------------
# recon_net forward (glue: top-k / argsort / gathers / scatter stay in XLA)
# ----------------------------------------------------------------------------

def recon_net_forward(params, point_cloud, detect_point, fps_idx1, fps_idx2,
                      coding, decoder_dim):
    del fps_idx1, fps_idx2                       # unused by the torch forward
    _, feature5, _ = coding                      # decoder only uses feature5
    B, N, _ = detect_point.shape

    K_CLOSE, K_FAR = 24, 12                      # knn_list[2] of decoder / decoder_far
    kmax = max(K_CLOSE, K_FAR)

    # single distance pass; min-distance and both decoders' kNN derive from it
    d2 = pairwise_d2(detect_point, point_cloud)               # (B, N, M)  Pallas
    neg, knn_idx = lax.top_k(-d2, kmax)                       # k smallest d2, sorted
    knn_d2 = -neg                                             # (B, N, kmax)
    dis = jnp.sqrt(jnp.maximum(knn_d2[..., 0], 0.0))          # nearest-neighbour dist

    # torch.topk(dis, N, largest=False, sorted=True) -> ascending argsort
    group_idx = jnp.argsort(dis, axis=-1)                     # (B, N)
    m_close = N * 2 // 3
    idx_close = group_idx[:, :m_close]
    idx_far = group_idx[:, m_close:]

    def _sel(idx, k):
        return (jnp.take_along_axis(knn_idx, idx[:, :, None], axis=1)[:, :, :k],
                jnp.take_along_axis(knn_d2, idx[:, :, None], axis=1)[:, :, :k])

    ci, cd = _sel(idx_close, K_CLOSE)
    fi, fd = _sel(idx_far, K_FAR)

    # decoder:     knn_list=[0,12,24], dim_scale=[1,1,2]
    # decoder_far: knn_list=[0,12,12], dim_scale=[1,1,1]
    logit_close = decoder_forward(params["close"], feature5, ci, cd,
                                  dim_scale=2, decoder_dim=decoder_dim)
    logit_far = decoder_forward(params["far"], feature5, fi, fd,
                                dim_scale=1, decoder_dim=decoder_dim)

    # logit.scatter_(1, group_idx.unsqueeze(2).repeat(1,1,2), src) reads only the
    # first index-shape rows / first 2 channels of src.
    logit = jnp.zeros((B, N, 2), jnp.float32)
    bar = jnp.arange(B)[:, None]
    logit = logit.at[bar, idx_close, :].set(logit_close[:, :m_close, :])
    logit = logit.at[bar, idx_far, :].set(logit_far[:, :idx_far.shape[1], :])
    return logit


# ----------------------------------------------------------------------------
# Deterministic parameter init
# ----------------------------------------------------------------------------

def _dense_init(key, cin, cout, scale=0.1):
    w = scale * jax.random.normal(key, (cin, cout), jnp.float32)
    b = jnp.zeros((1, cout), jnp.float32)
    return w, b


def init_params(key, encoder_dim, decoder_dim):
    ks = jax.random.split(key, 6)
    close, far = {}, {}
    # decoder (close): indicator3000 = upsample(encoder_dim -> decoder_dim * 2)
    close["up_w"], close["up_b"] = _dense_init(ks[0], encoder_dim, decoder_dim * 2)
    close["cls_w1"], close["cls_b1"] = _dense_init(ks[1], decoder_dim, decoder_dim // 2)
    close["cls_w2"], close["cls_b2"] = _dense_init(ks[2], decoder_dim // 2, 3)
    # decoder_far: indicator3000 = upsample(encoder_dim -> decoder_dim)
    far["up_w"], far["up_b"] = _dense_init(ks[3], encoder_dim, decoder_dim)
    far["cls_w1"], far["cls_b1"] = _dense_init(ks[4], decoder_dim, decoder_dim // 2)
    far["cls_w2"], far["cls_b2"] = _dense_init(ks[5], decoder_dim // 2, 3)
    return {"close": close, "far": far}


# ----------------------------------------------------------------------------
# Main
# ----------------------------------------------------------------------------

if __name__ == "__main__":
    B, N, M_PC = 2, 24, 64          # N detect points, M_PC point-cloud points
    ENC_DIM, DEC_DIM = 32, 32

    key = jax.random.PRNGKey(0)
    k_pc, k_dp, k_f4, k_f5, k_f6, k_p = jax.random.split(key, 6)

    point_cloud = jax.random.uniform(k_pc, (B, M_PC, 3), jnp.float32)
    detect_point = jax.random.uniform(k_dp, (B, N, 3), jnp.float32)
    feature4 = jax.random.normal(k_f4, (B, M_PC, ENC_DIM), jnp.float32)
    feature5 = jax.random.normal(k_f5, (B, M_PC, ENC_DIM), jnp.float32)
    feature6 = jax.random.normal(k_f6, (B, M_PC, ENC_DIM), jnp.float32)
    fps_idx1 = jnp.arange(B * 16, dtype=jnp.int32).reshape(B, 16)   # unused by forward
    fps_idx2 = jnp.arange(B * 8, dtype=jnp.int32).reshape(B, 8)     # unused by forward
    coding = (feature4, feature5, feature6)

    params = init_params(k_p, ENC_DIM, DEC_DIM)

    logit = recon_net_forward(params, point_cloud, detect_point,
                              fps_idx1, fps_idx2, coding, decoder_dim=DEC_DIM)
    jax.block_until_ready(logit)
    assert logit.shape == (B, N, 2) and logit.dtype == jnp.float32
    assert bool(jnp.all(jnp.isfinite(logit)))
    print("KERNEL_OK")
</pallas_src>

<mosaic_0001>
module attributes {stable_mosaic.version = 11 : i64} {
  func.func @_pairwise_d2_kernel(%arg0: i32, %arg1: i32, %arg2: i32, %arg3: memref<1x24x3xf32, #tpu.memory_space<vmem>>, %arg4: memref<1x3x128xf32, #tpu.memory_space<vmem>>, %arg5: memref<1x24x128xf32, #tpu.memory_space<vmem>>) attributes {dimension_semantics = [#tpu.dimension_semantics<parallel>, #tpu.dimension_semantics<parallel>, #tpu.dimension_semantics<parallel>], iteration_bounds = array<i64: 2, 1, 1>, scalar_prefetch = 0 : i64, scratch_operands = 0 : i64, tpu.core_type = #tpu.core_type<tc>, window_params = [{transform_indices = @transform_0, window_bounds = array<i64: 1, 24, 3>}, {transform_indices = @transform_1, window_bounds = array<i64: 1, 3, 128>}, {transform_indices = @transform_2, window_bounds = array<i64: 1, 24, 128>}]} {
    %c0 = arith.constant 0 : index
    %c0_0 = arith.constant 0 : index
    %c0_1 = arith.constant 0 : index
    %0 = vector.load %arg3[%c0, %c0_0, %c0_1] : memref<1x24x3xf32, #tpu.memory_space<vmem>>, vector<1x24x3xf32>
    %1 = vector.shape_cast %0 : vector<1x24x3xf32> to vector<24x3xf32>
    %c0_2 = arith.constant 0 : index
    %c0_3 = arith.constant 0 : index
    %c0_4 = arith.constant 0 : index
    %2 = vector.load %arg4[%c0_2, %c0_3, %c0_4] : memref<1x3x128xf32, #tpu.memory_space<vmem>>, vector<1x3x128xf32>
    %3 = vector.shape_cast %2 : vector<1x3x128xf32> to vector<3x128xf32>
    %4 = vector.extract_strided_slice %1 {offsets = [0, 0], sizes = [24, 1], strides = [1, 1]} : vector<24x3xf32> to vector<24x1xf32>
    %5 = vector.extract_strided_slice %3 {offsets = [0, 0], sizes = [1, 128], strides = [1, 1]} : vector<3x128xf32> to vector<1x128xf32>
    %6 = vector.broadcast %4 : vector<24x1xf32> to vector<24x128xf32>
    %7 = vector.broadcast %5 : vector<1x128xf32> to vector<24x128xf32>
    %8 = arith.subf %6, %7 : vector<24x128xf32>
    %9 = arith.mulf %8, %8 : vector<24x128xf32>
    %10 = vector.extract_strided_slice %1 {offsets = [0, 1], sizes = [24, 1], strides = [1, 1]} : vector<24x3xf32> to vector<24x1xf32>
    %11 = vector.extract_strided_slice %3 {offsets = [1, 0], sizes = [1, 128], strides = [1, 1]} : vector<3x128xf32> to vector<1x128xf32>
    %12 = vector.broadcast %10 : vector<24x1xf32> to vector<24x128xf32>
    %13 = vector.broadcast %11 : vector<1x128xf32> to vector<24x128xf32>
    %14 = arith.subf %12, %13 : vector<24x128xf32>
    %15 = arith.mulf %14, %14 : vector<24x128xf32>
    %16 = arith.addf %9, %15 : vector<24x128xf32>
    %17 = vector.extract_strided_slice %1 {offsets = [0, 2], sizes = [24, 1], strides = [1, 1]} : vector<24x3xf32> to vector<24x1xf32>
    %18 = vector.extract_strided_slice %3 {offsets = [2, 0], sizes = [1, 128], strides = [1, 1]} : vector<3x128xf32> to vector<1x128xf32>
    %19 = vector.broadcast %17 : vector<24x1xf32> to vector<24x128xf32>
    %20 = vector.broadcast %18 : vector<1x128xf32> to vector<24x128xf32>
    %21 = arith.subf %19, %20 : vector<24x128xf32>
    %22 = arith.mulf %21, %21 : vector<24x128xf32>
    %23 = arith.addf %16, %22 : vector<24x128xf32>
    %c0_5 = arith.constant 0 : index
    %c0_6 = arith.constant 0 : index
    %c0_7 = arith.constant 0 : index
    %24 = vector.load %arg5[%c0_5, %c0_6, %c0_7] : memref<1x24x128xf32, #tpu.memory_space<vmem>>, vector<1x24x128xf32>
    %25 = vector.shape_cast %24 : vector<1x24x128xf32> to vector<24x128xf32>
    %26 = vector.shape_cast %23 : vector<24x128xf32> to vector<1x24x128xf32>
    tpu.vector_store %arg5[%c0_5, %c0_6, %c0_7], %26 {strides = array<i32>} : memref<1x24x128xf32, #tpu.memory_space<vmem>>, vector<1x24x128xf32>,
    return
  }
  func.func @transform_0(%arg0: i32, %arg1: i32, %arg2: i32) -> (i32, i32, i32) {
    %c0_i32 = arith.constant 0 : i32
    %c0_i32_0 = arith.constant 0 : i32
    return %arg0, %arg1, %c0_i32 : i32, i32, i32
  }
  func.func @transform_1(%arg0: i32, %arg1: i32, %arg2: i32) -> (i32, i32, i32) {
    %c0_i32 = arith.constant 0 : i32
    %c0_i32_0 = arith.constant 0 : i32
    return %arg0, %c0_i32, %arg2 : i32, i32, i32
  }
  func.func @transform_2(%arg0: i32, %arg1: i32, %arg2: i32) -> (i32, i32, i32) {
    %c0_i32 = arith.constant 0 : i32
    return %arg0, %arg1, %arg2 : i32, i32, i32
  }
}

</mosaic_0001>

<bundles_post_ra>
// kernel: tpu_custom_call.1
= control target key start
LH: loop header
LB: loop body
LE: loop exit
PB: predicated region body
PF: predicated region fallthrough
CT: control target
= control target key end

     0   :  { %7 = vsyncpa [#allocation3], 0  ;;  %s709_s0 = inlined_call_operand.vmem [shape: f32[2,24,3], index: 0, kind: input, shape index: {}]   ;;  %s710_s1 = inlined_call_operand.vmem [shape: f32[2,3,128], index: 1, kind: input, shape index: {}]   ;;  %s711_s2 = inlined_call_operand.hbm [shape: f32[2,24,128], index: 2, kind: output, shape index: {}]  }
   0x1   :  { %9 = vsyncpa [#allocation3 + $0x1], 0  ;;  %s587_s9 = smov 0   ;;  %s589_s10 = smov 0  }
   0x2   :  { %s591_s11 = smov 0   ;;  %s593_s12 = smov 0  }
   0x3   :  { %s595_s13 = smov 0   ;;  %s597_s14 = smov 0  }
   0x4 LB: > { %s407_s15 = sadd.s32 4294967295, %s564_s14   ;;  %s408_s16 = sadd.s32 4294967294, %s564_s14   ;;  %s564_s14 = sphi %s597_s14, %s15_s14   ;;  %s560_s13 = sphi %s595_s13, %s718_s13   ;;  %s556_s12 = sphi %s593_s12, %s717_s12   ;;  %s552_s11 = sphi %s591_s11, %s716_s11   ;;  %s548_s10 = sphi %s589_s10, %s715_s10   ;;  %s544_s9 = sphi %s587_s9, %s714_s9  }
   0x5   : > { %s34_s17 = sadd.s32 1, %s560_s13  ;;  %s101_s18 = sadd.s32 1, %s552_s11 }
   0x6   : > { %p36_p0 = scmp.ge.s32.totalorder %s34_s17, 2  ;;  %p111_p1 = scmp.ne.s32.totalorder %s552_s11, %s548_s10 }
   0x7   : > { %p112_p2 = scmp.eq.s32.totalorder %s407_s15, 1  ;;  %p117_p3 = scmp.ne.s32.totalorder %s548_s10, %s544_s9 }
   0x8   : > { %s720_s17 = smov (%p36_p0, %s34_s17), 0  ;;  %p118_p5 = scmp.eq.s32.totalorder %s408_s16, 1 }
   0x9   : > { %p627_p4 = por %p112_p2, %p111_p1  ;;  %s94_s20 = ssub.s32 %s560_s13, %s720_s17 }
   0xa   : > { %p411_p6 = scmp.ge.s32.totalorder %s564_s14, 1  ;;  %p99_p7 = scmp.eq.s32.totalorder %s94_s20, 0 }
   0xb   : > { %p634_p8 = por %p118_p5, %p117_p3  ;;  %p159_p9 = scmp.lt.s32.totalorder %s564_s14, 3 }
   0xc   : > { %s640_s22 = scalar_select %p99_p7, %s552_s11, %s101_s18  }
   0xd   : > { %p160_p10 = pnand %p411_p6, %p159_p9 }
   0xe   : > { %p193_p11 = scmp.lt.s32.totalorder (!%p160_p10), %s556_s12, 1  ;;  %v566_v0 = vmov (!%p160_p10), 0   ;;  %v567_v4 = vmov (!%p160_p10), 1   ;;  %v568_v5 = vmov (!%p160_p10), 2   ;;  %v229_v6 = vlaneseq (!%p160_p10)  ;;  %s189_s4 = sand.u32 (!%p160_p10), 1, %s548_s10  }
   0xf   : > { %163 = sbr.rel (%p160_p10) target bundleno = 195 (0xc3), region = 28  ;;  %481 = vset.pattern.permute.xlu1 (!%p160_p10), %v566_v0  ;;  %480 = vset.pattern.permute.xlu0 (!%p160_p10), %v566_v0  ;;  %s663_s18 = scalar_lea.sflag (!%p160_p10), [#allocation3], %s189_s4 }
  0x10   : > { %v230_v7 = vshrl.u32 (!%p160_p10), %v229_v6, 7  ;;  %s417_s5 = smul.u32 (!%p160_p10), 24, %s189_s4 }
  0x11   : > { %s419_s6 = smul.u32 (!%p160_p10), 384, %s556_s12 }
  0x12   : > { %v253_v10 = vsub.s32 (!%p160_p10), 1, %v230_v7  ;;  %v231_v11 = vsub.s32 (!%p160_p10), 0, %v230_v7  ;;  %v278_v17 = vsub.s32 (!%p160_p10), 2, %v230_v7  ;;  %s191_s7 = scalar_lea.vmem (!%p160_p10), [#allocation2], %s417_s5 }
  0x13   : > { %s309_s8 = sshll.u32 (!%p160_p10), %s191_s7, 4  ;;  %s654_s8 = int_to_ptr.vmem [resolvable:$true] %s309_s8 }
  0x14   : > { %s486_s20 = scalar_lea.vmem (!%p160_p10), %s654_s8, 384 }
  0x15   : > { %p487_p12 = scmp.ne.s32.totalorder (!%p160_p10), %s654_s8, %s486_s20 }
  0x16   : > { %s194_s23 = scalar_select %p193_p11, %s556_s12, 1 }
  0x17   : > { %s659_s12 = scalar_lea.hbm %s711_s2, %s419_s6  ;;  %p488_p13 = pnand %p487_p12, %p627_p4 }
  0x18   : > { %s418_s24 = smul.u32 24, %s194_s23  ;;  %s413_s28 = sshll.u32 %s194_s23, 2 }
  0x19   : > { %s208_s3 = scalar_lea.vmem %s710_s1, %s413_s28  ;;  %p489_p0 = pneg %p488_p13 }
  0x1a   : > { %s200_s27 = scalar_lea.vmem %s709_s0, %s418_s24  ;;  %v213_v12 = vld [vmem:[%s208_s3] sm:$0x7]  ;;  %s569_s23 = smov [#allocation2]  }
  0x1b   : > { %v212_v1 = vld [vmem:[%s200_s27 + $0x10] sm:$0xff]  ;;  %v210_v2 = vld [vmem:[%s200_s27] sm:$0xff]  ;;  %v211_v3 = vld [vmem:[%s200_s27 + $0x8] sm:$0xff]  ;;  %v254_v14 = vrot.slane %v213_v12, %v253_v10  ;;  %v232_v16 = vrot.slane %v213_v12, %v231_v11  ;;  %v279_v24 = vrot.slane %v213_v12, %v278_v17  ;;  %s490_s24 = sshll.u32 %s569_s23, 4  ;;  %s491_s24 = int_to_ptr.vmem [resolvable:$false] %s490_s24 }
  0x1c   : > { %226 = vperm.xlu1 %481, %v212_v1   ;;  %216 = vperm.xlu0 %480, %v210_v2   ;;  %s492_s25 = scalar_lea.vmem %s491_s24, 768  ;;  %p493_p1 = scmp.lt.s32.totalorder %s654_s8, %s491_s24 }
  0x1d   : > { %p494_p2 = scmp.lt.s32.totalorder %s492_s25, %s486_s20 }
  0x1f   : > { %p495_p3 = por %p494_p2, %p493_p1 }
  0x20   : > { %482 = vset.pattern.permute.xlu1 %v567_v4  ;;  %221 = vperm.xlu0 %480, %v211_v3  }
  0x21   : > { %240 = vperm.xlu1 %482, %v210_v2   ;;  %p496_p5 = pnand %p495_p3, %p489_p0 }
  0x24   : > { %483 = vset.pattern.permute.xlu0 %v567_v4 }
  0x25   : > { %248 = vperm.xlu1 %482, %v212_v1   ;;  %244 = vperm.xlu0 %483, %v211_v3  }
  0x29   : > { %484 = vset.pattern.permute.xlu1 %v568_v5  ;;  %485 = vset.pattern.permute.xlu0 %v568_v5 }
  0x2a   : > { %265 = vperm.xlu1 %484, %v210_v2   ;;  %269 = vperm.xlu0 %485, %v211_v3  }
  0x2e   : > { %273 = vperm.xlu1 %484, %v212_v1  }
  0x9b   : > { %v227_v8 = vpop.permute.xlu1 %226  ;;  %v217_v9 = vpop.permute.xlu0 %216 }
  0x9c   : > { %v233_v18 = vsub.f32 %v217_v9, %v232_v16  ;;  %v235_v31 = vsub.f32 %v227_v8, %v232_v16 }
  0x9e   : > { %v236_v25 = vmul.f32 %v233_v18, %v233_v18  ;;  %v238_v41 = vmul.f32 %v235_v31, %v235_v31 }
  0x9f   : > { %v222_v13 = vpop.permute.xlu0 %221 }
  0xa0   : > { %v241_v15 = vpop.permute.xlu1 %240  ;;  %v234_v23 = vsub.f32 %v222_v13, %v232_v16 }
  0xa1   : > { %v255_v19 = vsub.f32 %v241_v15, %v254_v14 }
  0xa2   : > { %v237_v32 = vmul.f32 %v234_v23, %v234_v23 }
  0xa3   : > { %v258_v26 = vmul.f32 %v255_v19, %v255_v19 }
  0xa4   : > { %v249_v20 = vpop.permute.xlu1 %248  ;;  %v245_v21 = vpop.permute.xlu0 %244 }
  0xa5   : > { %v256_v22 = vsub.f32 %v245_v21, %v254_v14  ;;  %v257_v27 = vsub.f32 %v249_v20, %v254_v14  ;;  %v261_v35 = vadd.f32 %v258_v26, %v236_v25 }
  0xa7   : > { %v259_v28 = vmul.f32 %v256_v22, %v256_v22  ;;  %v260_v36 = vmul.f32 %v257_v27, %v257_v27 }
  0xa9   : > { %v266_v29 = vpop.permute.xlu1 %265  ;;  %v270_v30 = vpop.permute.xlu0 %269  ;;  %v262_v37 = vadd.f32 %v259_v28, %v237_v32  ;;  %v263_v45 = vadd.f32 %v260_v36, %v238_v41 }
  0xaa   : > { %v280_v33 = vsub.f32 %v266_v29, %v279_v24  ;;  %v281_v34 = vsub.f32 %v270_v30, %v279_v24 }
  0xac   : > { %v283_v38 = vmul.f32 %v280_v33, %v280_v33  ;;  %v284_v39 = vmul.f32 %v281_v34, %v281_v34 }
  0xad   : > { %v274_v40 = vpop.permute.xlu1 %273 }
  0xae   : > { %v286_v42 = vadd.f32 %v283_v38, %v261_v35  ;;  %v287_v43 = vadd.f32 %v284_v39, %v262_v37  ;;  %v282_v44 = vsub.f32 %v274_v40, %v279_v24 }
  0xb0   : > { %289 = vst [vmem:[%s191_s7] sm:$0xff] %v286_v42  ;;  %290 = vst [vmem:[%s191_s7 + $0x8] sm:$0xff] %v287_v43  ;;  %v285_v46 = vmul.f32 %v282_v44, %v282_v44 }
  0xb2   : > { %v288_v47 = vadd.f32 %v285_v46, %v263_v45 }
  0xb4   : > { %291 = vst [vmem:[%s191_s7 + $0x10] sm:$0xff] %v288_v47 }
  0xb5   : > { %499 = shalt.err (!%p496_p5)
}
  0xb6   : > { %s500_s26 = scalar_lea.hbm %s659_s12, 384  ;;  %s504_s29 = scalar_lea.hbm %s711_s2, 768 }
  0xb7   : > { %p501_p6 = scmp.ne.s32.totalorder %s659_s12, %s500_s26  ;;  %p505_p10 = scmp.lt.u32.totalorder %s659_s12, %s711_s2 }
  0xb8   : > { %p506_p11 = scmp.lt.u32.totalorder %s504_s29, %s500_s26  ;;  %p508_p13 = scmp.lt.u32.totalorder %s500_s26, %s659_s12 }
  0xb9   : > { %p502_p7 = pnand %p501_p6, %p627_p4 }
  0xba   : > { %p507_p12 = por %p506_p11, %p505_p10 }
  0xbb   : > { %p503_p9 = pneg %p502_p7 }
  0xbc   : > { %p509_p0 = por %p508_p13, %p507_p12 }
  0xbe   : > { %p510_p1 = pnand %p509_p0, %p503_p9 }
  0xc0   : > { %513 = shalt.err (!%p510_p1)
}
  0xc1   : > { %s570_s4 = smov 128   ;;  %s571_s5 = smov 8  }
  0xc2   : > { %420 = dma.vmem_to_hbm [thread:$0]  (%p627_p4), %s654_s8, 384, %s659_s12, %s663_s18, %s570_s4, %s570_s4, %s571_s5  }
  0xc3 PF: > { %p426_p2 = scmp.ge.s32.totalorder %s564_s14, 2  ;;  %s324_s6 = sand.u32 1, %s544_s9  }
  0xc4   : > { %s325_s7 = scalar_lea.sflag [#allocation3], %s324_s6 }
  0xc5   : > { %p423_p3 = pnand %p426_p2, %p634_p8 }
  0xc7   : > { %539 = dma.done.wait (!%p423_p3), %s325_s7, 384  }
  0xc8   : > { %541 = vsyncadd (!%p423_p3), %s325_s7, 4294966912  ;;  %s15_s14 = sadd.s32 1, %s564_s14   ;;  %s714_s9 = smov %s548_s10 }
  0xc9   : > { %p12_p5 = scmp.ge.s32.totalorder %s15_s14, 4   ;;  %s715_s10 = smov %s552_s11 }
  0xca   : > { %s716_s11 = smov %s640_s22  ;;  %s717_s12 = smov %s560_s13 }
  0xcb   : > { %s718_s13 = smov %s720_s17  ;;  %14 = sbr.rel (!%p12_p5) target bundleno = 4 (0x4), region = 66 }
  0xd2   :  { %330 = vsyncpa [#allocation3], 1 }
  0xd3   :  { %332 = vsyncpa [#allocation3 + $0x1], 1 }

</bundles_post_ra>
